<compile_context>
chip_gen: v7x
topology: tpu7x:2x2x1
jax: 0.10.0
libtpu: 0.0.40
codegen_flags: <defaults>
</compile_context>

<pallas_src>
import functools
import math

import jax
import jax.numpy as jnp
from jax import lax
from jax.experimental import pallas as pl
from jax.experimental.pallas import tpu as pltpu

EPS = 1e-05
_LANES = 128
_MAX_FK = 32768              # cap on folded feature width (keeps min tile <= ~8 MiB)


def _accumulate(x_ref, sum_ref, sq_ref, *, tt, slab, t0=None, tk=None):
    """Add sum / sum-of-squares of the current tile into the accumulators.

    Walks the tile's time rows `slab` at a time so in-kernel f32 temporaries
    stay small.  If `t0` is given, rows with global (folded) time index >= tk
    are masked out (only final partial / phantom tiles take this path); the
    mask is a (1, size, 1) iota broadcast, never a full-tile tensor.
    """
    def add(start, size):
        xs = x_ref[:, pl.ds(start, size), :].astype(jnp.float32)
        if t0 is not None:
            offs = lax.broadcasted_iota(jnp.int32, (1, size, 1), 1)
            xs = jnp.where(t0 + start + offs < tk, xs, 0.0)
        sum_ref[...] += jnp.sum(xs, axis=1)
        sq_ref[...] += jnp.sum(xs * xs, axis=1)

    n_slabs, rem = divmod(tt, slab)
    if n_slabs == 1:
        add(0, slab)
    elif n_slabs > 1:
        def body(i, carry):
            add(pl.multiple_of(i * slab, slab), slab)
            return carry
        lax.fori_loop(0, n_slabs, body, 0)
    if rem:
        add(n_slabs * slab, rem)


def _sum_sq_kernel(x_ref, sum_ref, sq_ref, *, tt, tk, gpc, slab, has_partial):
    """Streaming per-chunk sum / sumsq over the (folded) time axis.

    x_ref:   (TB, TT, FK)  current input tile.
    sum_ref: (TB, FK) f32  per-chunk running sum   (output, resident across t).
    sq_ref:  (TB, FK) f32  per-chunk running sumsq (output, resident across t).
    """
    c = pl.program_id(0)
    t = pl.program_id(2)

    @pl.when(t == 0)
    def _init():
        sum_ref[...] = jnp.zeros_like(sum_ref)
        sq_ref[...] = jnp.zeros_like(sq_ref)

    if has_partial:
        t0 = (c * gpc + t) * tt          # global start row of this (virtual) tile

        @pl.when(t0 + tt <= tk)          # hot path: fully in-bounds, no mask
        def _full():
            _accumulate(x_ref, sum_ref, sq_ref, tt=tt, slab=slab)

        @pl.when(t0 + tt > tk)           # final partial / phantom tiles only
        def _partial():
            _accumulate(x_ref, sum_ref, sq_ref, tt=tt, slab=slab, t0=t0, tk=tk)
    else:
        _accumulate(x_ref, sum_ref, sq_ref, tt=tt, slab=slab)


def _pick_lane_fold(T, F):
    """Fold factor k (k | T): reshape (B,T,F)->(B,T/k,k*F).

    Prefer the smallest k making k*F a multiple of 128 (fully dense vregs,
    unmasked stores, fk may exceed 128) while keeping >= 8 folded time rows;
    fall back to the largest k <= 128//F dividing T."""
    if F % _LANES == 0:
        return 1
    k0 = _LANES // math.gcd(F, _LANES)          # smallest k with (k*F) % 128 == 0
    if k0 * F <= _MAX_FK:
        for k in range(k0, T + 1, k0):
            if k * F > _MAX_FK:
                break
            if T % k == 0 and T // k >= 8:
                return k
    if F >= _LANES:
        return 1
    for k in range(min(max(1, _LANES // F), T), 0, -1):
        if T % k == 0:
            return k
    return 1


def _pick_time_tile(tk, tb, fk, itemsize, target_tile_bytes):
    """Time-tile size (multiple of 8 or full extent), ~target_tile_bytes.

    Prefer a tile that divides tk so no tile ever needs tail masking."""
    row_bytes = max(1, tb * fk * itemsize)
    tt_target = max(8, target_tile_bytes // row_bytes)
    if tt_target >= tk:
        return tk, 1                              # single full-extent time block
    tt_target = (tt_target // 8) * 8
    cand = tt_target
    while cand >= 8 and cand * 4 >= tt_target:    # don't shrink below target/4
        if tk % cand == 0:
            return cand, tk // cand               # mask-free tiling
        cand -= 8
    return tt_target, pl.cdiv(tk, tt_target)      # masked tail tile (last only)


def _pick_slab(tt, tb, fk, slab_bytes):
    """Time rows per in-kernel accumulation slab (bounds f32 temporaries)."""
    if tt <= 8:
        return tt
    rows = slab_bytes // max(1, tb * fk * 4)
    rows = max(8, (rows // 8) * 8)
    return min(tt, rows)


def statistics_pooling(x, key, return_mean=True, return_std=True, eps=EPS,
                       target_tile_bytes=16 * 1024 * 1024,
                       slab_bytes=512 * 1024):
    """JAX/Pallas equivalent of speechbrain StatisticsPooling.forward (lengths=None)."""
    if not (return_mean or return_std):
        raise ValueError("both of statistics are equal to False")
    B, T, F = x.shape

    # Lane-fold time into features when F is lane-sparse (exact for sum/sumsq).
    k = _pick_lane_fold(T, F)
    tk, fk = T // k, k * F
    x_folded = x.reshape(B, tk, fk) if k > 1 else x

    tb = B if B <= 8 else 8
    grid_b = pl.cdiv(B, tb)
    itemsize = jnp.dtype(x.dtype).itemsize
    tt, grid_t_real = _pick_time_tile(tk, tb, fk, itemsize, target_tile_bytes)
    slab = _pick_slab(tt, tb, fk, slab_bytes)

    # Split time into 2 "parallel" chunks (partial sums combined in the wrapper)
    # so both TensorCores are used even when grid_b == 1 (small-batch case).
    n_chunks = 2 if grid_t_real >= 2 else 1
    gpc = pl.cdiv(grid_t_real, n_chunks)
    has_phantom = n_chunks * gpc > grid_t_real       # at most one extra tile
    has_partial = n_chunks * gpc * tt > tk           # any tile needing a mask

    if has_phantom:
        last_tile = grid_t_real - 1
        x_index = lambda c, b, t: (b, jnp.minimum(c * gpc + t, last_tile), 0)
    else:
        x_index = lambda c, b, t: (b, c * gpc + t, 0)
    out_index = lambda c, b, t: (c, b, 0)            # resident across t (accumulator)

    kernel = functools.partial(_sum_sq_kernel, tt=tt, tk=tk, gpc=gpc,
                               slab=slab, has_partial=has_partial)

    tile_bytes = tb * tt * fk * itemsize
    vmem_limit = int(min(48 * 1024 * 1024,
                         max(32 * 1024 * 1024, 2 * tile_bytes + (8 << 20))))

    sum_p, sq_p = pl.pallas_call(
        kernel,
        out_shape=(jax.ShapeDtypeStruct((n_chunks, B, fk), jnp.float32),
                   jax.ShapeDtypeStruct((n_chunks, B, fk), jnp.float32)),
        grid_spec=pltpu.PrefetchScalarGridSpec(
            num_scalar_prefetch=0,
            grid=(n_chunks, grid_b, gpc),
            in_specs=[pl.BlockSpec((tb, tt, fk), x_index)],
            out_specs=[pl.BlockSpec((None, tb, fk), out_index),
                       pl.BlockSpec((None, tb, fk), out_index)]),
        compiler_params=pltpu.CompilerParams(
            dimension_semantics=("parallel", "parallel", "arbitrary"),
            vmem_limit_bytes=vmem_limit),
    )(x_folded)

    # Tiny finalize on (B, F): combine chunks, fold lanes, mean/std, noise, eps.
    s = jnp.sum(sum_p, axis=0)
    q = jnp.sum(sq_p, axis=0)
    if k > 1:
        s = s.reshape(B, k, F).sum(axis=1)
        q = q.reshape(B, k, F).sum(axis=1)
    mean = s / T
    denom = (T - 1) if T > 1 else 1                  # unbiased (torch.std default)
    var = jnp.maximum((q - T * mean * mean) / denom, 0.0)   # guard fp cancellation
    std = jnp.sqrt(var)

    outs = []
    if return_mean:
        g = jax.random.normal(key, (B, F), dtype=jnp.float32)
        g = g - jnp.min(g)
        g = g / jnp.max(g)
        gnoise = eps * (-8.0 * g + 9.0)              # eps * ((1-9)*g + 9)
        outs.append(mean + gnoise)
    if return_std:
        outs.append(std + eps)
    pooled = outs[0] if len(outs) == 1 else jnp.concatenate(outs, axis=1)
    return pooled[:, None, :].astype(x.dtype)


def _make_gnoise(key, shape, eps=EPS):
    g = jax.random.normal(key, shape, dtype=jnp.float32)
    g = g - jnp.min(g)
    g = g / jnp.max(g)
    return eps * (-8.0 * g + 9.0)


def _reference(x, gnoise, eps=EPS):
    """Pure-JAX reference (torch semantics, lengths=None)."""
    xf = x.astype(jnp.float32)
    mean = jnp.mean(xf, axis=1) + gnoise
    std = jnp.std(xf, axis=1, ddof=1) + eps
    return jnp.concatenate([mean, std], axis=1)[:, None, :].astype(x.dtype)


if __name__ == "__main__":
    root = jax.random.PRNGKey(0)
    k_x, k_noise = jax.random.split(root)

    def check(x, key, atol, **kw):
        out = jax.block_until_ready(statistics_pooling(x, key, **kw))
        B, _, F = x.shape
        ref = _reference(x, _make_gnoise(key, (B, F)))
        assert out.shape == (B, 1, 2 * F), out.shape
        assert jnp.allclose(out.astype(jnp.float32), ref.astype(jnp.float32),
                            atol=atol, rtol=atol), "mismatch vs reference"

    # 1) Small shape (speechbrain convention [batch, time, feat]); single tile.
    x1 = jax.random.uniform(k_x, (2, 8, 32), dtype=jnp.float32)
    check(x1, k_noise, 1e-4)

    # 2) Streamed multi-tile grid with chunked ("parallel") time axis,
    #    masked tail tile and one phantom tile.
    x2 = jax.random.uniform(k_x, (2, 72, 32), dtype=jnp.float32)
    check(x2, k_noise, 1e-4, target_tile_bytes=4 * 1024)

    # 3) bf16 streaming (narrow HBM dtype, f32 accumulation), mask-free tiling.
    x3 = jax.random.uniform(k_x, (3, 128, 64), dtype=jnp.bfloat16)
    check(x3, k_noise, 3e-2, target_tile_bytes=8 * 1024)

    # 4) Slab-walked accumulation inside a tile (fori_loop + remainder slab).
    x4 = jax.random.uniform(k_x, (2, 320, 128), dtype=jnp.float32)
    check(x4, k_noise, 1e-4, target_tile_bytes=40 * 1024, slab_bytes=16 * 1024)

    print("KERNEL_OK")
</pallas_src>

<mosaic_0001>
module attributes {stable_mosaic.version = 11 : i64} {
  func.func @_sum_sq_kernel(%arg0: i32, %arg1: i32, %arg2: i32, %arg3: memref<2x2x128xf32, #tpu.memory_space<vmem>>, %arg4: memref<1x2x128xf32, #tpu.memory_space<vmem>>, %arg5: memref<1x2x128xf32, #tpu.memory_space<vmem>>) attributes {dimension_semantics = [#tpu.dimension_semantics<parallel>, #tpu.dimension_semantics<parallel>, #tpu.dimension_semantics<arbitrary>], iteration_bounds = array<i64: 1, 1, 1>, scalar_prefetch = 0 : i64, scratch_operands = 0 : i64, tpu.core_type = #tpu.core_type<tc>, window_params = [{transform_indices = @transform_0, window_bounds = array<i64: 2, 2, 128>}, {transform_indices = @transform_1, window_bounds = array<i64: 1, 2, 128>}, {transform_indices = @transform_2, window_bounds = array<i64: 1, 2, 128>}]} {
    %c0_i32 = arith.constant 0 : i32
    %0 = arith.cmpi eq, %arg2, %c0_i32 : i32
    %1 = arith.extui %0 : i1 to i32
    %c0_i32_0 = arith.constant 0 : i32
    %2 = arith.cmpi ne, %1, %c0_i32_0 : i32
    scf.if %2 {
      %cst_16 = arith.constant 0.000000e+00 : f32
      %19 = vector.broadcast %cst_16 : f32 to vector<2x128xf32>
      %c0_17 = arith.constant 0 : index
      %c0_18 = arith.constant 0 : index
      %c0_19 = arith.constant 0 : index
      %20 = vector.load %arg4[%c0_17, %c0_18, %c0_19] : memref<1x2x128xf32, #tpu.memory_space<vmem>>, vector<1x2x128xf32>
      %21 = vector.shape_cast %20 : vector<1x2x128xf32> to vector<2x128xf32>
      %22 = vector.shape_cast %19 : vector<2x128xf32> to vector<1x2x128xf32>
      tpu.vector_store %arg4[%c0_17, %c0_18, %c0_19], %22 {strides = array<i32>} : memref<1x2x128xf32, #tpu.memory_space<vmem>>, vector<1x2x128xf32>,
      %cst_20 = arith.constant 0.000000e+00 : f32
      %23 = vector.broadcast %cst_20 : f32 to vector<2x128xf32>
      %c0_21 = arith.constant 0 : index
      %c0_22 = arith.constant 0 : index
      %c0_23 = arith.constant 0 : index
      %24 = vector.load %arg5[%c0_21, %c0_22, %c0_23] : memref<1x2x128xf32, #tpu.memory_space<vmem>>, vector<1x2x128xf32>
      %25 = vector.shape_cast %24 : vector<1x2x128xf32> to vector<2x128xf32>
      %26 = vector.shape_cast %23 : vector<2x128xf32> to vector<1x2x128xf32>
      tpu.vector_store %arg5[%c0_21, %c0_22, %c0_23], %26 {strides = array<i32>} : memref<1x2x128xf32, #tpu.memory_space<vmem>>, vector<1x2x128xf32>,
    } else {
    }
    %c0 = arith.constant 0 : index
    %c0_1 = arith.constant 0 : index
    %c0_2 = arith.constant 0 : index
    %3 = vector.load %arg3[%c0, %c0_1, %c0_2] : memref<2x2x128xf32, #tpu.memory_space<vmem>>, vector<2x2x128xf32>
    %c0_3 = arith.constant 0 : index
    %c0_4 = arith.constant 0 : index
    %c0_5 = arith.constant 0 : index
    %4 = vector.load %arg4[%c0_3, %c0_4, %c0_5] : memref<1x2x128xf32, #tpu.memory_space<vmem>>, vector<1x2x128xf32>
    %5 = vector.shape_cast %4 : vector<1x2x128xf32> to vector<2x128xf32>
    %cst = arith.constant dense<0.000000e+00> : vector<2x128xf32>
    %6 = vector.multi_reduction <add>, %3, %cst [1] : vector<2x2x128xf32> to vector<2x128xf32>
    %7 = arith.addf %5, %6 : vector<2x128xf32>
    %c0_6 = arith.constant 0 : index
    %c0_7 = arith.constant 0 : index
    %c0_8 = arith.constant 0 : index
    %8 = vector.load %arg4[%c0_6, %c0_7, %c0_8] : memref<1x2x128xf32, #tpu.memory_space<vmem>>, vector<1x2x128xf32>
    %9 = vector.shape_cast %8 : vector<1x2x128xf32> to vector<2x128xf32>
    %10 = vector.shape_cast %7 : vector<2x128xf32> to vector<1x2x128xf32>
    tpu.vector_store %arg4[%c0_6, %c0_7, %c0_8], %10 {strides = array<i32>} : memref<1x2x128xf32, #tpu.memory_space<vmem>>, vector<1x2x128xf32>,
    %c0_9 = arith.constant 0 : index
    %c0_10 = arith.constant 0 : index
    %c0_11 = arith.constant 0 : index
    %11 = vector.load %arg5[%c0_9, %c0_10, %c0_11] : memref<1x2x128xf32, #tpu.memory_space<vmem>>, vector<1x2x128xf32>
    %12 = vector.shape_cast %11 : vector<1x2x128xf32> to vector<2x128xf32>
    %13 = arith.mulf %3, %3 : vector<2x2x128xf32>
    %cst_12 = arith.constant dense<0.000000e+00> : vector<2x128xf32>
    %14 = vector.multi_reduction <add>, %13, %cst_12 [1] : vector<2x2x128xf32> to vector<2x128xf32>
    %15 = arith.addf %12, %14 : vector<2x128xf32>
    %c0_13 = arith.constant 0 : index
    %c0_14 = arith.constant 0 : index
    %c0_15 = arith.constant 0 : index
    %16 = vector.load %arg5[%c0_13, %c0_14, %c0_15] : memref<1x2x128xf32, #tpu.memory_space<vmem>>, vector<1x2x128xf32>
    %17 = vector.shape_cast %16 : vector<1x2x128xf32> to vector<2x128xf32>
    %18 = vector.shape_cast %15 : vector<2x128xf32> to vector<1x2x128xf32>
    tpu.vector_store %arg5[%c0_13, %c0_14, %c0_15], %18 {strides = array<i32>} : memref<1x2x128xf32, #tpu.memory_space<vmem>>, vector<1x2x128xf32>,
    return
  }
  func.func @transform_0(%arg0: i32, %arg1: i32, %arg2: i32) -> (i32, i32, i32) {
    %c1_i32 = arith.constant 1 : i32
    %0 = arith.muli %arg0, %c1_i32 : i32
    %1 = arith.addi %0, %arg2 : i32
    %c0_i32 = arith.constant 0 : i32
    %c0_i32_0 = arith.constant 0 : i32
    return %arg1, %1, %c0_i32 : i32, i32, i32
  }
  func.func @transform_1(%arg0: i32, %arg1: i32, %arg2: i32) -> (i32, i32, i32) {
    %c0_i32 = arith.constant 0 : i32
    %c0_i32_0 = arith.constant 0 : i32
    return %arg0, %arg1, %c0_i32 : i32, i32, i32
  }
  func.func @transform_2(%arg0: i32, %arg1: i32, %arg2: i32) -> (i32, i32, i32) {
    %c0_i32 = arith.constant 0 : i32
    %c0_i32_0 = arith.constant 0 : i32
    return %arg0, %arg1, %c0_i32 : i32, i32, i32
  }
}

</mosaic_0001>

<bundles_post_ra>
// kernel: tpu_custom_call.1
= control target key start
LH: loop header
LB: loop body
LE: loop exit
PB: predicated region body
PF: predicated region fallthrough
CT: control target
= control target key end

     0   :  { %8 = vsyncpa [#allocation3], 0  ;;  %s250_s0 = inlined_call_operand.hbm [shape: f32[2,2,128], index: 0, kind: input, shape index: {}]   ;;  %s251_s1 = inlined_call_operand.hbm [shape: f32[1,2,128], index: 1, kind: output, shape index: {0}]   ;;  %s252_s2 = inlined_call_operand.hbm [shape: f32[1,2,128], index: 2, kind: output, shape index: {1}]  }
   0x1   :  { %9 = vsyncpa [#allocation4], 0 }
   0x2   :  { %10 = vsyncpa [#allocation7], 0  ;;  %s191_s9 = smov [#allocation2]   ;;  %s119_s13 = scalar_lea.hbm %s250_s0, 64 }
   0x3   :  { %s19_s10 = sshll.u32 %s191_s9, 4  ;;  %p120_p0 = scmp.ne.s32.totalorder %s250_s0, %s119_s13  ;;  %s20_s10 = int_to_ptr.vmem [resolvable:$true] %s19_s10 }
   0x4   :  { %p123_p1 = scmp.lt.u32.totalorder %s119_s13, %s250_s0 }
   0x6   :  { %p125_p2 = pnand %p123_p1, %p120_p0 }
   0x8   :  { %128 = shalt.err (!%p125_p2)
}
   0x9   :  { %s129_s18 = scalar_lea.vmem %s20_s10, 64  ;;  %p134_p4 = scmp.lt.s32.totalorder %s20_s10, %s20_s10 }
   0xa   :  { %p130_p3 = scmp.ne.s32.totalorder %s20_s10, %s129_s18  ;;  %p135_p5 = scmp.lt.s32.totalorder %s129_s18, %s129_s18 }
   0xc   :  { %p136_p6 = por %p135_p5, %p134_p4 }
   0xe   :  { %p137_p7 = pnand %p136_p6, %p130_p3 }
  0x10   :  { %140 = shalt.err (!%p137_p7)
}
  0x11   :  { %s192_s19 = smov 32   ;;  %s193_s20 = smov 2  }
  0x12   :  { %25 = dma.hbm_to_vmem [thread:$0]  %s250_s0, 64, %s20_s10, [#allocation3], %s192_s19, %s192_s19, %s193_s20  }
  0x13   :  { %185 = dma.done.wait [#allocation3], 64  }
  0x14   :  { %186 = vsyncadd [#allocation3], 4294967232  ;;  %v194_v0 = vmov 0.0   ;;  %vm39_vm0 = vcmask 1041408   ;;  %v36_v1 = vld [vmem:[#allocation2] sm:$0x3] }
  0x15   :  { %34 = vst [vmem:[#allocation5] sm:$0x3] %v194_v0  ;;  %35 = vst [vmem:[#allocation6] sm:$0x3] %v194_v0  ;;  %v37_v2 = vld [vmem:[#allocation2 + $0x2] sm:$0x3]  ;;  %v62_v5 = vmul.f32 %v36_v1, %v36_v1 }
  0x16   :  { %v40_v3 = vsel %vm39_vm0, %v36_v1, 0.0  ;;  %v47_v4 = vsel %vm39_vm0, %v37_v2, 0.0  ;;  %v63_v6 = vmul.f32 %v37_v2, %v37_v2  ;;  %vm56_vm1 = vcmask 1041409   ;;  %s195_s0 = smov [#allocation5]   ;;  %s196_s24 = smov [#allocation6]  }
  0x17   :  { %v41_v7 = vrot.slane %v40_v3, 4  ;;  %v48_v8 = vrot.slane %v47_v4, 4  ;;  %v64_v9 = vsel %vm39_vm0, %v62_v5, 0.0  ;;  %s90_s23 = sshll.u32 %s195_s0, 4  ;;  %s100_s25 = sshll.u32 %s196_s24, 4  ;;  %s91_s23 = int_to_ptr.vmem [resolvable:$true] %s90_s23  ;;  %s101_s25 = int_to_ptr.vmem [resolvable:$true] %s100_s25 }
  0x18   :  { %v71_v10 = vsel %vm39_vm0, %v63_v6, 0.0  ;;  %v65_v13 = vrot.slane %v64_v9, 4  ;;  %s141_s26 = scalar_lea.vmem %s91_s23, 32  ;;  %p146_p9 = scmp.lt.s32.totalorder %s91_s23, %s91_s23 }
  0x19   :  { %v42_v11 = vadd.f32 %v41_v7, %v40_v3  ;;  %v49_v12 = vadd.f32 %v48_v8, %v47_v4  ;;  %v72_v14 = vrot.slane %v71_v10, 4  ;;  %p142_p8 = scmp.ne.s32.totalorder %s91_s23, %s141_s26  ;;  %p147_p10 = scmp.lt.s32.totalorder %s141_s26, %s141_s26 }
  0x1a   :  { %v66_v17 = vadd.f32 %v65_v13, %v64_v9 }
  0x1b   :  { %v43_v15 = vrot.slane %v42_v11, 2  ;;  %v50_v16 = vrot.slane %v49_v12, 2  ;;  %v73_v18 = vadd.f32 %v72_v14, %v71_v10  ;;  %p148_p11 = por %p147_p10, %p146_p9 }
  0x1c   :  { %v67_v21 = vrot.slane %v66_v17, 2  ;;  %v38_v27 = vld [vmem:[#allocation5] sm:$0x3]  ;;  %v61_v33 = vld [vmem:[#allocation6] sm:$0x3] }
  0x1d   :  { %v44_v19 = vadd.f32 %v43_v15, %v42_v11  ;;  %v51_v20 = vadd.f32 %v50_v16, %v49_v12  ;;  %v74_v22 = vrot.slane %v73_v18, 2  ;;  %p149_p12 = pnand %p148_p11, %p142_p8 }
  0x1e   :  { %v68_v25 = vadd.f32 %v67_v21, %v66_v17 }
  0x1f   :  { %v45_v23 = vrot.slane %v44_v19, 1  ;;  %v52_v24 = vrot.slane %v51_v20, 1  ;;  %v75_v26 = vadd.f32 %v74_v22, %v73_v18 }
  0x20   :  { %v69_v30 = vrot.slane %v68_v25, 1 }
  0x21   :  { %v46_v28 = vadd.f32 %v45_v23, %v44_v19  ;;  %v53_v29 = vadd.f32 %v52_v24, %v51_v20  ;;  %v76_v31 = vrot.slane %v75_v26, 1 }
  0x22   :  { %v70_v34 = vadd.f32 %v69_v30, %v68_v25 }
  0x23   :  { %v57_v32 = vsel %vm56_vm1, %v53_v29, %v46_v28  ;;  %v77_v35 = vadd.f32 %v76_v31, %v75_v26 }
  0x24   :  { %v59_v36 = vadd.f32 %v57_v32, %v38_v27 }
  0x25   :  { %v80_v37 = vsel %vm56_vm1, %v77_v35, %v70_v34 }
  0x26   :  { %60 = vst [vmem:[#allocation5] sm:$0x3] %v59_v36  ;;  %v82_v38 = vadd.f32 %v80_v37, %v61_v33 }
  0x27   :  { %152 = shalt.err (!%p149_p12)
}
  0x28   :  { %s153_s29 = scalar_lea.hbm %s251_s1, 32 }
  0x29   :  { %p154_p13 = scmp.ne.s32.totalorder %s251_s1, %s153_s29  ;;  %p157_p0 = scmp.lt.u32.totalorder %s153_s29, %s251_s1 }
  0x2b   :  { %p159_p1 = pnand %p157_p0, %p154_p13 }
  0x2d   :  { %162 = shalt.err (!%p159_p1)
}
  0x2e   :  { %93 = dma.vmem_to_hbm [thread:$0]  %s91_s23, 32, %s251_s1, [#allocation4]   ;;  %83 = vst [vmem:[#allocation6] sm:$0x3] %v82_v38 }
  0x2f   :  { %s163_s8 = scalar_lea.vmem %s101_s25, 32  ;;  %p168_p3 = scmp.lt.s32.totalorder %s101_s25, %s101_s25 }
  0x30   :  { %p164_p2 = scmp.ne.s32.totalorder %s101_s25, %s163_s8  ;;  %p169_p4 = scmp.lt.s32.totalorder %s163_s8, %s163_s8 }
  0x32   :  { %p170_p5 = por %p169_p4, %p168_p3 }
  0x34   :  { %p171_p6 = pnand %p170_p5, %p164_p2 }
  0x36   :  { %174 = shalt.err (!%p171_p6)
}
  0x37   :  { %s175_s11 = scalar_lea.hbm %s252_s2, 32 }
  0x38   :  { %p176_p7 = scmp.ne.s32.totalorder %s252_s2, %s175_s11  ;;  %p179_p8 = scmp.lt.u32.totalorder %s175_s11, %s252_s2 }
  0x3a   :  { %p181_p9 = pnand %p179_p8, %p176_p7 }
  0x3c   :  { %184 = shalt.err (!%p181_p9)
}
  0x3d   :  { %103 = dma.vmem_to_hbm [thread:$0]  %s101_s25, 32, %s252_s2, [#allocation7]  }
  0x3e   :  { %187 = dma.done.wait [#allocation4], 32  }
  0x3f   :  { %188 = vsyncadd [#allocation4], 4294967264 }
  0x40   :  { %189 = dma.done.wait [#allocation7], 32  }
  0x41   :  { %190 = vsyncadd [#allocation7], 4294967264 }
  0x42   :  { %110 = vsyncpa [#allocation3], 1 }
  0x43   :  { %111 = vsyncpa [#allocation4], 1 }
  0x44   :  { %112 = vsyncpa [#allocation7], 1 }

</bundles_post_ra>
